<compile_context>
chip_gen: v6e
topology: v6e:2x2x1
jax: 0.10.0
libtpu: 0.0.40
codegen_flags: <defaults>
</compile_context>

<pallas_src>
import jax
import jax.numpy as jnp
from jax.experimental import pallas as pl
from jax.experimental.pallas import tpu as pltpu

N_OBSERVATIONS = 6   # Acrobot-v1 observation dim
N_ACTIONS = 3        # Acrobot-v1 action dim
HIDDEN = 128

K1_PAD = 8           # layer-1 contraction pad (sublane multiple)
OUT_ROWS = 8         # n_actions padded to a sublane multiple
LANE = 128           # lane width: batch tile is a multiple of this
TB_MAX = 1024        # max batch tile (lane axis); ~1.6 MiB/tile of VMEM temporaries
SPLIT_MIN_B = 256    # force >=2 tiles above this batch so both v7x TCs are busy


def _dqn_kernel(x_ref, w1_ref, b1_ref, w2_ref, b2_ref, w3_ref, b3_ref, o_ref):
    """One batch tile (batch on the lane axis) of the 3-layer MLP.

    x_ref : (K1_PAD, tb)        f32   (x^T, features padded 6 -> 8)
    w1_ref: (HIDDEN, K1_PAD)    f32   b1_ref: (HIDDEN, 1)  f32
    w2_ref: (HIDDEN, HIDDEN)    bf16  b2_ref: (HIDDEN, 1)  f32
    w3_ref: (OUT_ROWS, HIDDEN)  bf16  b3_ref: (OUT_ROWS, 1) f32
    o_ref : (OUT_ROWS, tb)      f32   (out^T)
    """
    # Layer 1: tiny K (=8), f32 operands (W1 is only 4 KB, VMEM-resident).
    h1 = jnp.dot(w1_ref[...], x_ref[...], preferred_element_type=jnp.float32)
    h1 = jnp.maximum(h1 + b1_ref[...], 0.0)

    # Layers 2/3: bf16 weights on the MXU, f32 accumulation, f32 epilogue.
    h2 = jnp.dot(w2_ref[...], h1.astype(jnp.bfloat16),
                 preferred_element_type=jnp.float32)
    h2 = jnp.maximum(h2 + b2_ref[...], 0.0)

    out = jnp.dot(w3_ref[...], h2.astype(jnp.bfloat16),
                  preferred_element_type=jnp.float32)
    o_ref[...] = (out + b3_ref[...]).astype(o_ref.dtype)


def prepare_params(params):
    """One-time weight prep: orient as MXU LHS for the transposed compute."""
    w1, b1, w2, b2, w3, b3 = params   # PyTorch (out_features, in_features) layout

    w1_p = jnp.zeros((HIDDEN, K1_PAD), jnp.float32)
    w1_p = w1_p.at[:, :N_OBSERVATIONS].set(w1)                  # (128, 8)   f32
    b1_p = b1.reshape(HIDDEN, 1).astype(jnp.float32)            # (128, 1)   f32

    w2_p = w2.astype(jnp.bfloat16)                               # (128, 128) bf16
    b2_p = b2.reshape(HIDDEN, 1).astype(jnp.float32)            # (128, 1)   f32

    w3_p = jnp.zeros((OUT_ROWS, HIDDEN), jnp.bfloat16)
    w3_p = w3_p.at[:N_ACTIONS, :].set(w3.astype(jnp.bfloat16))  # (8, 128)   bf16
    b3_p = jnp.zeros((OUT_ROWS, 1), jnp.float32)
    b3_p = b3_p.at[:N_ACTIONS, 0].set(b3)                       # (8, 1)     f32

    return tuple(jax.device_put(p) for p in (w1_p, b1_p, w2_p, b2_p, w3_p, b3_p))


@jax.jit
def dqn_forward(x, prepped):
    """x: (B, N_OBSERVATIONS) f32 -> (B, N_ACTIONS) f32. `prepped` from prepare_params."""
    w1_p, b1_p, w2_p, b2_p, w3_p, b3_p = prepped
    B = x.shape[0]

    # --- static (trace-time) batch tiling; batch is the lane axis ---
    nb = max(1, -(-B // TB_MAX))
    if B >= SPLIT_MIN_B:
        nb = max(nb, 2)                   # v7x: keep both TensorCores busy
    tb = -(-B // nb)
    tb = (-(-tb // LANE)) * LANE          # lane-dense tiles (multiple of 128)
    nb = -(-B // tb)
    b_pad = nb * tb

    # Single tiny prep op per call: pad (features 6->8, batch -> b_pad) + transpose.
    xT = jnp.pad(x, ((0, b_pad - B), (0, K1_PAD - N_OBSERVATIONS))).T  # (8, b_pad)

    const2 = lambda i: (0, 0)   # weights/biases stay VMEM-resident across tiles

    flops = 2 * b_pad * (K1_PAD * HIDDEN + HIDDEN * HIDDEN + HIDDEN * OUT_ROWS)
    bytes_accessed = (
        K1_PAD * b_pad * 4            # x^T read
        + OUT_ROWS * b_pad * 4        # out^T write
        + HIDDEN * K1_PAD * 4 + HIDDEN * HIDDEN * 2 + OUT_ROWS * HIDDEN * 2
        + (2 * HIDDEN + OUT_ROWS) * 4  # biases
    )

    outT = pl.pallas_call(
        _dqn_kernel,
        out_shape=jax.ShapeDtypeStruct((OUT_ROWS, b_pad), jnp.float32),
        grid=(nb,),
        in_specs=[
            pl.BlockSpec((K1_PAD, tb), lambda i: (0, i)),       # x^T tile
            pl.BlockSpec((HIDDEN, K1_PAD), const2),             # W1
            pl.BlockSpec((HIDDEN, 1), const2),                  # b1
            pl.BlockSpec((HIDDEN, HIDDEN), const2),             # W2
            pl.BlockSpec((HIDDEN, 1), const2),                  # b2
            pl.BlockSpec((OUT_ROWS, HIDDEN), const2),           # W3
            pl.BlockSpec((OUT_ROWS, 1), const2),                # b3
        ],
        out_specs=pl.BlockSpec((OUT_ROWS, tb), lambda i: (0, i)),
        compiler_params=pltpu.CompilerParams(
            dimension_semantics=("parallel",)),
        cost_estimate=pl.CostEstimate(
            flops=flops, transcendentals=0, bytes_accessed=bytes_accessed),
    )(xT, w1_p, b1_p, w2_p, b2_p, w3_p, b3_p)

    return outT[:N_ACTIONS, :B].T


def init_params(key):
    """Deterministic init mimicking PyTorch nn.Linear defaults
    (uniform in [-1/sqrt(fan_in), 1/sqrt(fan_in)])."""
    def linear(key, out_f, in_f):
        kw, kb = jax.random.split(key)
        bound = 1.0 / jnp.sqrt(in_f)
        w = jax.random.uniform(kw, (out_f, in_f), jnp.float32, -bound, bound)
        b = jax.random.uniform(kb, (out_f,), jnp.float32, -bound, bound)
        return w, b

    k1, k2, k3 = jax.random.split(key, 3)
    w1, b1 = linear(k1, HIDDEN, N_OBSERVATIONS)
    w2, b2 = linear(k2, HIDDEN, HIDDEN)
    w3, b3 = linear(k3, N_ACTIONS, HIDDEN)
    return (w1, b1, w2, b2, w3, b3)


def _reference_forward(x, params):
    w1, b1, w2, b2, w3, b3 = params
    h1 = jnp.maximum(x @ w1.T + b1, 0.0)
    h2 = jnp.maximum(h1 @ w2.T + b2, 0.0)
    return h2 @ w3.T + b3


if __name__ == "__main__":
    key = jax.random.PRNGKey(0)
    kp, kx1, kx2 = jax.random.split(key, 3)

    params = init_params(kp)
    prepped = prepare_params(params)   # one-time weight prep (not per call)

    # bf16 weights in layers 2/3 => relaxed tolerance vs. the f32 reference.
    ATOL = 5e-2

    # 1) Small inference-style batch (single grid step, single lane tile).
    x_small = jax.random.normal(kx1, (2, N_OBSERVATIONS), jnp.float32)
    out_small = jax.block_until_ready(dqn_forward(x_small, prepped))
    ref_small = _reference_forward(x_small, params)
    assert out_small.shape == (2, N_ACTIONS), out_small.shape
    err_s = jnp.max(jnp.abs(out_small - ref_small))
    assert jnp.allclose(out_small, ref_small, atol=ATOL, rtol=ATOL), (
        f"small-batch mismatch: max err {err_s}")

    # 2) Training-style batch exercising the multi-tile batch grid + padding.
    x_big = jax.random.normal(kx2, (600, N_OBSERVATIONS), jnp.float32)
    out_big = jax.block_until_ready(dqn_forward(x_big, prepped))
    ref_big = _reference_forward(x_big, params)
    assert out_big.shape == (600, N_ACTIONS), out_big.shape
    err_b = jnp.max(jnp.abs(out_big - ref_big))
    assert jnp.allclose(out_big, ref_big, atol=ATOL, rtol=ATOL), (
        f"big-batch mismatch: max err {err_b}")

    print("KERNEL_OK")
</pallas_src>

<mosaic_0001>
module attributes {stable_mosaic.version = 11 : i64} {
  func.func @_dqn_kernel(%arg0: i32, %arg1: memref<8x128xf32, #tpu.memory_space<vmem>>, %arg2: memref<128x8xf32, #tpu.memory_space<vmem>>, %arg3: memref<128x1xf32, #tpu.memory_space<vmem>>, %arg4: memref<128x128xbf16, #tpu.memory_space<vmem>>, %arg5: memref<128x1xf32, #tpu.memory_space<vmem>>, %arg6: memref<8x128xbf16, #tpu.memory_space<vmem>>, %arg7: memref<8x1xf32, #tpu.memory_space<vmem>>, %arg8: memref<8x128xf32, #tpu.memory_space<vmem>>) attributes {dimension_semantics = [#tpu.dimension_semantics<parallel>], iteration_bounds = array<i64: 1>, scalar_prefetch = 0 : i64, scratch_operands = 0 : i64, tpu.core_type = #tpu.core_type<tc>, window_params = [{transform_indices = @transform_0, window_bounds = array<i64: 8, 128>}, {pipeline_mode = #tpu.pipeline_mode<synchronous>, transform_indices = @transform_1, window_bounds = array<i64: 128, 8>}, {pipeline_mode = #tpu.pipeline_mode<synchronous>, transform_indices = @transform_2, window_bounds = array<i64: 128, 1>}, {pipeline_mode = #tpu.pipeline_mode<synchronous>, transform_indices = @transform_3, window_bounds = array<i64: 128, 128>}, {pipeline_mode = #tpu.pipeline_mode<synchronous>, transform_indices = @transform_4, window_bounds = array<i64: 128, 1>}, {pipeline_mode = #tpu.pipeline_mode<synchronous>, transform_indices = @transform_5, window_bounds = array<i64: 8, 128>}, {pipeline_mode = #tpu.pipeline_mode<synchronous>, transform_indices = @transform_6, window_bounds = array<i64: 8, 1>}, {transform_indices = @transform_7, window_bounds = array<i64: 8, 128>}]} {
    %c0 = arith.constant 0 : index
    %c0_0 = arith.constant 0 : index
    %0 = vector.load %arg2[%c0, %c0_0] : memref<128x8xf32, #tpu.memory_space<vmem>>, vector<128x8xf32>
    %c0_1 = arith.constant 0 : index
    %c0_2 = arith.constant 0 : index
    %1 = vector.load %arg1[%c0_1, %c0_2] : memref<8x128xf32, #tpu.memory_space<vmem>>, vector<8x128xf32>
    %cst = arith.constant dense<0.000000e+00> : vector<128x128xf32>
    %2 = tpu.matmul %0, %1, %cst {dimension_numbers = #tpu.dot_dimension_numbers<[1], [0], [0], [1], [0, 0, 1, 1], [], []>} : vector<128x8xf32>, vector<8x128xf32>, vector<128x128xf32> -> vector<128x128xf32>
    %c0_3 = arith.constant 0 : index
    %c0_4 = arith.constant 0 : index
    %3 = vector.load %arg3[%c0_3, %c0_4] : memref<128x1xf32, #tpu.memory_space<vmem>>, vector<128x1xf32>
    %4 = vector.broadcast %3 : vector<128x1xf32> to vector<128x128xf32>
    %5 = arith.addf %2, %4 : vector<128x128xf32>
    %cst_5 = arith.constant 0.000000e+00 : f32
    %6 = vector.broadcast %cst_5 : f32 to vector<128x128xf32>
    %7 = arith.maximumf %5, %6 : vector<128x128xf32>
    %c0_6 = arith.constant 0 : index
    %c0_7 = arith.constant 0 : index
    %8 = vector.load %arg4[%c0_6, %c0_7] : memref<128x128xbf16, #tpu.memory_space<vmem>>, vector<128x128xbf16>
    %9 = arith.truncf %7 : vector<128x128xf32> to vector<128x128xbf16>
    %cst_8 = arith.constant dense<0.000000e+00> : vector<128x128xf32>
    %10 = tpu.matmul %8, %9, %cst_8 {dimension_numbers = #tpu.dot_dimension_numbers<[1], [0], [0], [1], [0, 0, 1, 1], [], []>} : vector<128x128xbf16>, vector<128x128xbf16>, vector<128x128xf32> -> vector<128x128xf32>
    %c0_9 = arith.constant 0 : index
    %c0_10 = arith.constant 0 : index
    %11 = vector.load %arg5[%c0_9, %c0_10] : memref<128x1xf32, #tpu.memory_space<vmem>>, vector<128x1xf32>
    %12 = vector.broadcast %11 : vector<128x1xf32> to vector<128x128xf32>
    %13 = arith.addf %10, %12 : vector<128x128xf32>
    %cst_11 = arith.constant 0.000000e+00 : f32
    %14 = vector.broadcast %cst_11 : f32 to vector<128x128xf32>
    %15 = arith.maximumf %13, %14 : vector<128x128xf32>
    %c0_12 = arith.constant 0 : index
    %c0_13 = arith.constant 0 : index
    %16 = vector.load %arg6[%c0_12, %c0_13] : memref<8x128xbf16, #tpu.memory_space<vmem>>, vector<8x128xbf16>
    %17 = arith.truncf %15 : vector<128x128xf32> to vector<128x128xbf16>
    %cst_14 = arith.constant dense<0.000000e+00> : vector<8x128xf32>
    %18 = tpu.matmul %16, %17, %cst_14 {dimension_numbers = #tpu.dot_dimension_numbers<[1], [0], [0], [1], [0, 0, 1, 1], [], []>} : vector<8x128xbf16>, vector<128x128xbf16>, vector<8x128xf32> -> vector<8x128xf32>
    %c0_15 = arith.constant 0 : index
    %c0_16 = arith.constant 0 : index
    %19 = vector.load %arg7[%c0_15, %c0_16] : memref<8x1xf32, #tpu.memory_space<vmem>>, vector<8x1xf32>
    %20 = vector.broadcast %19 : vector<8x1xf32> to vector<8x128xf32>
    %21 = arith.addf %18, %20 : vector<8x128xf32>
    %c0_17 = arith.constant 0 : index
    %c0_18 = arith.constant 0 : index
    %22 = vector.load %arg8[%c0_17, %c0_18] : memref<8x128xf32, #tpu.memory_space<vmem>>, vector<8x128xf32>
    tpu.vector_store %arg8[%c0_17, %c0_18], %21 {strides = array<i32>} : memref<8x128xf32, #tpu.memory_space<vmem>>, vector<8x128xf32>,
    return
  }
  func.func @transform_0(%arg0: i32) -> (i32, i32) {
    %c0_i32 = arith.constant 0 : i32
    %c0_i32_0 = arith.constant 0 : i32
    return %c0_i32, %arg0 : i32, i32
  }
  func.func @transform_1(%arg0: i32) -> (i32, i32) {
    %c0_i32 = arith.constant 0 : i32
    %c0_i32_0 = arith.constant 0 : i32
    %c0_i32_1 = arith.constant 0 : i32
    return %c0_i32, %c0_i32_0 : i32, i32
  }
  func.func @transform_2(%arg0: i32) -> (i32, i32) {
    %c0_i32 = arith.constant 0 : i32
    %c0_i32_0 = arith.constant 0 : i32
    %c0_i32_1 = arith.constant 0 : i32
    return %c0_i32, %c0_i32_0 : i32, i32
  }
  func.func @transform_3(%arg0: i32) -> (i32, i32) {
    %c0_i32 = arith.constant 0 : i32
    %c0_i32_0 = arith.constant 0 : i32
    %c0_i32_1 = arith.constant 0 : i32
    return %c0_i32, %c0_i32_0 : i32, i32
  }
  func.func @transform_4(%arg0: i32) -> (i32, i32) {
    %c0_i32 = arith.constant 0 : i32
    %c0_i32_0 = arith.constant 0 : i32
    %c0_i32_1 = arith.constant 0 : i32
    return %c0_i32, %c0_i32_0 : i32, i32
  }
  func.func @transform_5(%arg0: i32) -> (i32, i32) {
    %c0_i32 = arith.constant 0 : i32
    %c0_i32_0 = arith.constant 0 : i32
    %c0_i32_1 = arith.constant 0 : i32
    return %c0_i32, %c0_i32_0 : i32, i32
  }
  func.func @transform_6(%arg0: i32) -> (i32, i32) {
    %c0_i32 = arith.constant 0 : i32
    %c0_i32_0 = arith.constant 0 : i32
    %c0_i32_1 = arith.constant 0 : i32
    return %c0_i32, %c0_i32_0 : i32, i32
  }
  func.func @transform_7(%arg0: i32) -> (i32, i32) {
    %c0_i32 = arith.constant 0 : i32
    %c0_i32_0 = arith.constant 0 : i32
    return %c0_i32, %arg0 : i32, i32
  }
}

</mosaic_0001>

<bundles_post_ra>
// kernel: dqn_forward.1
= control target key start
LH: loop header
LB: loop body
LE: loop exit
PB: predicated region body
PF: predicated region fallthrough
CT: control target
= control target key end

     0   :  { %vm140_vm0 = vcmask 64512   ;;  %v848_v3 = vmov 0   ;;  %vm850_vm1 = vmmov 0   ;;  %s1114_s0 = inlined_call_operand.vmem [shape: f32[8,128], index: 0, kind: input, shape index: {}]   ;;  %s1115_s1 = inlined_call_operand.vmem [shape: f32[128,8], index: 1, kind: input, shape index: {}]   ;;  %s1116_s2 = inlined_call_operand.vmem [shape: f32[128,1], index: 2, kind: input, shape index: {}]   ;;  %s1117_s4 = inlined_call_operand.vmem [shape: f32[128,1], index: 4, kind: input, shape index: {}]   ;;  %s1118_s6 = inlined_call_operand.vmem [shape: f32[8,1], index: 6, kind: input, shape index: {}]   ;;  %s1119_s3 = inlined_call_operand.vmem [shape: bf16[128,128], index: 3, kind: input, shape index: {}]   ;;  %s1120_s5 = inlined_call_operand.vmem [shape: bf16[8,128], index: 5, kind: input, shape index: {}]   ;;  %s1121_s7 = inlined_call_operand.vmem [shape: f32[8,128], index: 7, kind: output, shape index: {}]  }
   0x1   :  { %v43_v0 = vld [vmem:[%s1114_s0] sm:$0xff]  ;;  %v28_v2 = vld [vmem:[%s1115_s1 + $0x8] sm:$0xff]  ;;  %838 = vset.pattern.permute.xlu0 %v848_v3  ;;  %839 = vset.pattern.permute.xlu1 %v848_v3  ;;  %v29_v4 = vld [vmem:[%s1115_s1 + $0x10] sm:$0xff] }
   0x2   :  { %v27_v1 = vld [vmem:[%s1115_s1] sm:$0xff]  ;;  %757 = vmatprep.subr.mxu0 %v43_v0  ;;  %v30_v5 = vld [vmem:[%s1115_s1 + $0x18] sm:$0xff]  ;;  %v58_v7 = vld [vmem:[%s1116_s2 + $0x70] sm:$0xff] }
   0x3   :  { %759 = vmatprep.mubr.msk.f32.mxu0 %vm140_vm0, %v27_v1  ;;  %758 = vmatpush3.msra.mxu0 %v43_v0  ;;  %v31_v6 = vld [vmem:[%s1115_s1 + $0x20] sm:$0xff]  ;;  %v59_v9 = vld [vmem:[%s1116_s2 + $0x78] sm:$0xff]  ;;  %v32_v10 = vld [vmem:[%s1115_s1 + $0x28] sm:$0xff] }
   0x4   :  { %760 = vmatmul.mubr.msk.f32.vlgmr.msra.gmra.mxu0 %vm140_vm0, %v28_v2  ;;  %132 = vperm.xlu0 %838, %v58_v7   ;;  %v56_v8 = vld [vmem:[%s1116_s2 + $0x60] sm:$0xff]  ;;  %v57_v11 = vld [vmem:[%s1116_s2 + $0x68] sm:$0xff]  ;;  %v33_v12 = vld [vmem:[%s1115_s1 + $0x30] sm:$0xff] }
   0x5   :  { %762 = vmatprep.mubr.msk.f32.mxu0 %vm140_vm0, %v29_v4  ;;  %122 = vperm.xlu1 %839, %v56_v8   ;;  %v54_v13 = vld [vmem:[%s1116_s2 + $0x50] sm:$0xff]  ;;  %v34_v14 = vld [vmem:[%s1115_s1 + $0x38] sm:$0xff]  ;;  %v35_v16 = vld [vmem:[%s1115_s1 + $0x40] sm:$0xff] }
   0x6   :  { %v55_v15 = vld [vmem:[%s1116_s2 + $0x58] sm:$0xff]  ;;  %v52_v17 = vld [vmem:[%s1116_s2 + $0x40] sm:$0xff]  ;;  %v36_v18 = vld [vmem:[%s1115_s1 + $0x48] sm:$0xff] }
   0x7   :  { %v53_v19 = vld [vmem:[%s1116_s2 + $0x48] sm:$0xff]  ;;  %v37_v20 = vld [vmem:[%s1115_s1 + $0x50] sm:$0xff]  ;;  %v38_v22 = vld [vmem:[%s1115_s1 + $0x58] sm:$0xff] }
   0x8   :  { %763 = vmatmul.mubr.msk.f32.gmra.mxu0 %vm140_vm0, %v30_v5  ;;  %137 = vperm.xlu0 %838, %v59_v9   ;;  %v50_v21 = vld [vmem:[%s1116_s2 + $0x30] sm:$0xff]  ;;  %v51_v23 = vld [vmem:[%s1116_s2 + $0x38] sm:$0xff]  ;;  %v39_v24 = vld [vmem:[%s1115_s1 + $0x60] sm:$0xff] }
   0x9   :  { %765 = vmatprep.mubr.msk.f32.mxu0 %vm140_vm0, %v31_v6  ;;  %127 = vperm.xlu1 %839, %v57_v11   ;;  %v48_v25 = vld [vmem:[%s1116_s2 + $0x20] sm:$0xff]  ;;  %v40_v26 = vld [vmem:[%s1115_s1 + $0x68] sm:$0xff]  ;;  %v41_v28 = vld [vmem:[%s1115_s1 + $0x70] sm:$0xff] }
   0xa   :  { %v49_v27 = vld [vmem:[%s1116_s2 + $0x28] sm:$0xff]  ;;  %v46_v29 = vld [vmem:[%s1116_s2 + $0x10] sm:$0xff]  ;;  %v42_v30 = vld [vmem:[%s1115_s1 + $0x78] sm:$0xff] }
   0xb   :  { %v47_v31 = vld [vmem:[%s1116_s2 + $0x18] sm:$0xff]  ;;  %v44_v32 = vld [vmem:[%s1116_s2] sm:$0xff]  ;;  %v45_v33 = vld [vmem:[%s1116_s2 + $0x8] sm:$0xff] }
   0xc   :  { %766 = vmatmul.mubr.msk.f32.gmra.mxu0 %vm140_vm0, %v32_v10  ;;  %112 = vperm.xlu0 %838, %v54_v13   ;;  %v388_v34 = vld [vmem:[%s1117_s4 + $0x70] sm:$0xff]  ;;  %v389_v35 = vld [vmem:[%s1117_s4 + $0x78] sm:$0xff]  ;;  %v386_v36 = vld [vmem:[%s1117_s4 + $0x60] sm:$0xff] }
   0xd   :  { %768 = vmatprep.mubr.msk.f32.mxu0 %vm140_vm0, %v33_v12  ;;  %117 = vperm.xlu1 %839, %v55_v15   ;;  %v387_v37 = vld [vmem:[%s1117_s4 + $0x68] sm:$0xff]  ;;  %v384_v38 = vld [vmem:[%s1117_s4 + $0x50] sm:$0xff]  ;;  %v385_v39 = vld [vmem:[%s1117_s4 + $0x58] sm:$0xff] }
   0xe   :  { %v382_v40 = vld [vmem:[%s1117_s4 + $0x40] sm:$0xff]  ;;  %v383_v41 = vld [vmem:[%s1117_s4 + $0x48] sm:$0xff]  ;;  %v380_v42 = vld [vmem:[%s1117_s4 + $0x30] sm:$0xff] }
   0xf   :  { %v381_v43 = vld [vmem:[%s1117_s4 + $0x38] sm:$0xff]  ;;  %v378_v44 = vld [vmem:[%s1117_s4 + $0x20] sm:$0xff]  ;;  %v379_v45 = vld [vmem:[%s1117_s4 + $0x28] sm:$0xff] }
  0x10   :  { %769 = vmatmul.mubr.msk.f32.gmra.mxu0 %vm140_vm0, %v34_v14  ;;  %102 = vperm.xlu0 %838, %v52_v17   ;;  %v376_v46 = vld [vmem:[%s1117_s4 + $0x10] sm:$0xff]  ;;  %v377_v47 = vld [vmem:[%s1117_s4 + $0x18] sm:$0xff]  ;;  %v374_v48 = vld [vmem:[%s1117_s4] sm:$0xff] }
  0x11   :  { %771 = vmatprep.mubr.msk.f32.mxu0 %vm140_vm0, %v35_v16  ;;  %107 = vperm.xlu1 %839, %v53_v19   ;;  %v375_v49 = vld [vmem:[%s1117_s4 + $0x8] sm:$0xff]  ;;  %v640_v50 = vld [vmem:[%s1118_s6] sm:$0xff] }
  0x12   :  { %v840_v51 = vld [vmem:[%s1119_s3] sm:$0xff]  }
  0x13   :  { %799 = vmatprep.mubr.bf16.mxu1 %v840_v51 }
  0x14   :  { %772 = vmatmul.mubr.msk.f32.gmra.mxu0 %vm140_vm0, %v36_v18  ;;  %92 = vperm.xlu0 %838, %v50_v21  }
  0x15   :  { %774 = vmatprep.mubr.msk.f32.mxu0 %vm140_vm0, %v37_v20  ;;  %97 = vperm.xlu1 %839, %v51_v23  }
  0x18   :  { %775 = vmatmul.mubr.msk.f32.gmra.mxu0 %vm140_vm0, %v38_v22  ;;  %82 = vperm.xlu0 %838, %v48_v25  }
  0x19   :  { %777 = vmatprep.mubr.msk.f32.mxu0 %vm140_vm0, %v39_v24  ;;  %87 = vperm.xlu1 %839, %v49_v27  }
  0x1c   :  { %778 = vmatmul.mubr.msk.f32.gmra.mxu0 %vm140_vm0, %v40_v26  ;;  %72 = vperm.xlu0 %838, %v46_v29  }
  0x1d   :  { %780 = vmatprep.mubr.msk.f32.mxu0 %vm140_vm0, %v41_v28  ;;  %77 = vperm.xlu1 %839, %v47_v31  }
  0x20   :  { %781 = vmatmul.mubr.msk.f32.gmra.mxu0 %vm140_vm0, %v42_v30  ;;  %62 = vperm.xlu0 %838, %v44_v32  }
  0x21   :  { %67 = vperm.xlu1 %839, %v45_v33  }
  0x24   :  { %462 = vperm.xlu0 %838, %v388_v34  }
  0x25   :  { %467 = vperm.xlu1 %839, %v389_v35  }
  0x28   :  { %452 = vperm.xlu0 %838, %v386_v36  }
  0x29   :  { %457 = vperm.xlu1 %839, %v387_v37  }
  0x2c   :  { %442 = vperm.xlu0 %838, %v384_v38  }
  0x2d   :  { %447 = vperm.xlu1 %839, %v385_v39  }
  0x30   :  { %432 = vperm.xlu0 %838, %v382_v40  }
  0x31   :  { %437 = vperm.xlu1 %839, %v383_v41  }
  0x34   :  { %422 = vperm.xlu0 %838, %v380_v42  }
  0x35   :  { %427 = vperm.xlu1 %839, %v381_v43  }
  0x38   :  { %412 = vperm.xlu0 %838, %v378_v44  }
  0x39   :  { %417 = vperm.xlu1 %839, %v379_v45  }
  0x3c   :  { %402 = vperm.xlu0 %838, %v376_v46  }
  0x3d   :  { %407 = vperm.xlu1 %839, %v377_v47  }
  0x40   :  { %392 = vperm.xlu0 %838, %v374_v48  }
  0x41   :  { %397 = vperm.xlu1 %839, %v375_v49  }
  0x44   :  { %643 = vperm.xlu0 %838, %v640_v50  }
  0x7f   :  { %v133_v57 = vpop.permute.xlu0 %132 }
  0x80   :  { %v123_v59 = vpop.permute.xlu1 %122 }
  0x83   :  { %v138_v62 = vpop.permute.xlu0 %137 }
  0x84   :  { %v128_v0 = vpop.permute.xlu1 %127 }
  0x87   :  { %v113_v3 = vpop.permute.xlu0 %112 }
  0x88   :  { %v118_v5 = vpop.permute.xlu1 %117 }
  0x8b   :  { %v103_v8 = vpop.permute.xlu0 %102 }
  0x8c   :  { %v108_v12 = vpop.permute.xlu1 %107 }
  0x8f   :  { %v93_v20 = vpop.permute.xlu0 %92 }
  0x90   :  { %v98_v24 = vpop.permute.xlu1 %97 }
  0x93   :  { %v83_v30 = vpop.permute.xlu0 %82 }
  0x94   :  { %v88_v34 = vpop.permute.xlu1 %87 }
  0x97   :  { %v73_v40 = vpop.permute.xlu0 %72 }
  0x98   :  { %v78_v43 = vpop.permute.xlu1 %77 }
  0x9b   :  { %v63_v49 = vpop.permute.xlu0 %62 }
  0xc4   :  { %v1060_v52 = vpop.f32.mrf.mxu0 }
  0xc6   :  { %v1062_v53 = vpop.f32.mrf.mxu0 }
  0xc7   :  { %v256_v50 = vadd.f32 %v1062_v53, %v63_v49  ;;  %v841_v53 = vld [vmem:[%s1119_s3 + $0x8] sm:$0xff]  }
  0xc8   :  { %v1064_v54 = vpop.f32.mrf.mxu0 }
  0xc9   :  { %v271_v47 = vadd.f32 %v1064_v54, %v78_v43  ;;  %v842_v54 = vld [vmem:[%s1119_s3 + $0x10] sm:$0xff]  }
  0xca   :  { %v265_v55 = vpop.f32.mrf.mxu0 }
  0xcb   :  { %v266_v44 = vadd.f32 %v265_v55, %v73_v40 }
  0xcc   :  { %v767_v56 = vpop.f32.mrf.mxu0 }
  0xcd   :  { %v281_v41 = vadd.f32 %v767_v56, %v88_v34  ;;  %v336_v51 = vmax.f32 %v266_v44, 0.0 }
  0xce   :  { %v275_v58 = vpop.f32.mrf.mxu0 }
  0xcf   :  { %v276_v37 = vadd.f32 %v275_v58, %v83_v30  ;;  %v339_v48 = vmax.f32 %v281_v41, 0.0  ;;  %v68_v58 = vpop.permute.xlu1 %67 }
  0xd0   :  { %v770_v60 = vpop.f32.mrf.mxu0  ;;  %v261_v56 = vadd.f32 %v1060_v52, %v68_v58  ;;  %v843_v52 = vld [vmem:[%s1119_s3 + $0x18] sm:$0xff]  }
  0xd1   :  { %v291_v35 = vadd.f32 %v770_v60, %v98_v24  ;;  %v338_v45 = vmax.f32 %v276_v37, 0.0  ;;  %v334_v60 = vmax.f32 %v256_v50, 0.0 }
  0xd2   :  { %v285_v61 = vpop.f32.mrf.mxu0 }
  0xd3   :  { %v286_v31 = vadd.f32 %v285_v61, %v93_v20  ;;  %v341_v42 = vmax.f32 %v291_v35, 0.0  ;;  %v335_v61 = vmax.f32 %v261_v56, 0.0 }
  0xd4   :  { %v773_v63 = vpop.f32.mrf.mxu0 }
  0xd5   :  { %v301_v28 = vadd.f32 %v773_v63, %v108_v12  ;;  %v340_v38 = vmax.f32 %v286_v31, 0.0  ;;  %v844_v63 = vld [vmem:[%s1119_s3 + $0x20] sm:$0xff]  }
  0xd6   :  { %v295_v1 = vpop.f32.mrf.mxu0 }
  0xd7   :  { %v296_v25 = vadd.f32 %v295_v1, %v103_v8  ;;  %v343_v36 = vmax.f32 %v301_v28, 0.0  ;;  %v369_v46 = vpack.c.bf16 %v341_v42, %v340_v38  ;;  %v846_v1 = vld [vmem:[%s1119_s3 + $0x30] sm:$0xff]  }
  0xd8   :  { %v776_v2 = vpop.f32.mrf.mxu0 }
  0xd9   :  { %v311_v21 = vadd.f32 %v776_v2, %v118_v5  ;;  %v342_v32 = vmax.f32 %v296_v25, 0.0  ;;  %v847_v2 = vld [vmem:[%s1119_s3 + $0x38] sm:$0xff]  }
  0xda   :  { %v305_v4 = vpop.f32.mrf.mxu0 }
  0xdb   :  { %v306_v16 = vadd.f32 %v305_v4, %v113_v3  ;;  %v345_v29 = vmax.f32 %v311_v21, 0.0  ;;  %v370_v39 = vpack.c.bf16 %v343_v36, %v342_v32  ;;  %v849_v3 = vmov 0.0  }
  0xdc   :  { %v779_v6 = vpop.f32.mrf.mxu0  ;;  %815 = vmatprep.subr.bf16.mxu0 %v849_v3  ;;  %831 = vmatprep.mubr.msk.bf16.mxu0 %vm850_vm1, %v849_v3 }
  0xdd   :  { %v321_v14 = vadd.f32 %v779_v6, %v128_v0  ;;  %v344_v26 = vmax.f32 %v306_v16, 0.0  ;;  %v845_v0 = vld [vmem:[%s1119_s3 + $0x28] sm:$0xff]  }
  0xde   :  { %v315_v7 = vpop.f32.mrf.mxu0 }
  0xdf   :  { %v316_v10 = vadd.f32 %v315_v7, %v123_v59  ;;  %v347_v22 = vmax.f32 %v321_v14, 0.0  ;;  %v371_v33 = vpack.c.bf16 %v345_v29, %v344_v26  ;;  %v337_v59 = vmax.f32 %v271_v47, 0.0 }
  0xe0   :  { %v782_v9 = vpop.f32.mrf.mxu0 }
  0xe1   :  { %v331_v11 = vadd.f32 %v782_v9, %v138_v62  ;;  %v346_v17 = vmax.f32 %v316_v10, 0.0  ;;  %v367_v55 = vpack.c.bf16 %v337_v59, %v336_v51  ;;  %v366_v62 = vpack.c.bf16 %v335_v61, %v334_v60  ;;  %v468_v9 = vpop.permute.xlu1 %467 }
  0xe2   :  { %v325_v13 = vpop.f32.mrf.mxu0 }
  0xe3   :  { %v326_v15 = vadd.f32 %v325_v13, %v133_v57  ;;  %v349_v18 = vmax.f32 %v331_v11, 0.0  ;;  %v372_v27 = vpack.c.bf16 %v347_v22, %v346_v17  ;;  %v368_v57 = vpack.c.bf16 %v339_v48, %v338_v45  ;;  %v463_v11 = vpop.permute.xlu0 %462 }
  0xe5   :  { %v348_v19 = vmax.f32 %v326_v15, 0.0  ;;  %v458_v14 = vpop.permute.xlu1 %457 }
  0xe7   :  { %v373_v23 = vpack.c.bf16 %v349_v18, %v348_v19  ;;  %v453_v16 = vpop.permute.xlu0 %452 }
  0xe9   :  { %783 = vmatprep.subr.bf16.mxu1 %v373_v23  ;;  %v448_v19 = vpop.permute.xlu1 %447 }
  0xea   :  { %784 = vmatpush3.bf16.msra.mxu1 %v373_v23 }
  0xeb   :  { %785 = vmatprep.subr.bf16.mxu1 %v372_v27  ;;  %v443_v21 = vpop.permute.xlu0 %442 }
  0xed   :  { %v438_v25 = vpop.permute.xlu1 %437 }
  0xee   :  { %786 = vmatpush3.bf16.msra.mxu1 %v372_v27 }
  0xef   :  { %787 = vmatprep.subr.bf16.mxu1 %v371_v33  ;;  %v433_v28 = vpop.permute.xlu0 %432 }
  0xf1   :  { %v428_v37 = vpop.permute.xlu1 %427 }
  0xf2   :  { %788 = vmatpush3.bf16.msra.mxu1 %v371_v33 }
  0xf3   :  { %789 = vmatprep.subr.bf16.mxu1 %v370_v39  ;;  %v423_v40 = vpop.permute.xlu0 %422 }
  0xf6   :  { %790 = vmatpush3.bf16.msra.mxu1 %v370_v39 }
  0xf7   :  { %791 = vmatprep.subr.bf16.mxu1 %v369_v46  ;;  %v413_v50 = vpop.permute.xlu0 %412 }
  0xfa   :  { %792 = vmatpush3.bf16.msra.mxu1 %v369_v46  ;;  %v418_v46 = vpop.permute.xlu1 %417 }
  0xfb   :  { %793 = vmatprep.subr.bf16.mxu1 %v368_v57 }
  0xfe   :  { %794 = vmatpush3.bf16.msra.mxu1 %v368_v57  ;;  %v408_v60 = vpop.permute.xlu1 %407 }
  0xff   :  { %795 = vmatprep.subr.bf16.mxu1 %v367_v55 }
 0x102   :  { %796 = vmatpush3.bf16.msra.mxu1 %v367_v55 }
 0x103   :  { %797 = vmatprep.subr.bf16.mxu1 %v366_v62 }
 0x106   :  { %798 = vmatpush3.bf16.msra.mxu1 %v366_v62  ;;  %v403_v62 = vpop.permute.xlu0 %402 }
 0x109   :  { %800 = vmatmul.mubr.bf16.vlgmr.msra.gmra.mxu1 %v841_v53 }
 0x10a   :  { %803 = vmatprep.mubr.bf16.mxu1 %v842_v54 }
 0x111   :  { %804 = vmatmul.mubr.bf16.gmra.mxu1 %v843_v52 }
 0x112   :  { %807 = vmatprep.mubr.bf16.mxu1 %v844_v63 }
 0x119   :  { %808 = vmatmul.mubr.bf16.gmra.mxu1 %v845_v0 }
 0x11a   :  { %811 = vmatprep.mubr.bf16.mxu1 %v846_v1  ;;  %v398_v1 = vpop.permute.xlu1 %397 }
 0x121   :  { %812 = vmatmul.mubr.bf16.gmra.mxu1 %v847_v2 }
 0x1c9   :  { %v1092_v4 = vpop.f32.mrf.mxu1 }
 0x1ca   :  { %v561_v63 = vadd.f32 %v1092_v4, %v403_v62 }
 0x1cb   :  { %v1094_v5 = vpop.f32.mrf.mxu1 }
 0x1cd   :  { %v802_v6 = vpop.f32.mrf.mxu1 }
 0x1ce   :  { %v564_v53 = vadd.f32 %v802_v6, %v408_v60 }
 0x1cf   :  { %v1096_v7 = vpop.f32.mrf.mxu1 }
 0x1d0   :  { %v618_v2 = vmax.f32 %v564_v53, 0.0 }
 0x1d1   :  { %v805_v8 = vpop.f32.mrf.mxu1 }
 0x1d2   :  { %v577_v51 = vadd.f32 %v805_v8, %v423_v40  ;;  %v556_v8 = vadd.f32 %v1096_v7, %v398_v1  ;;  %v631_v7 = vld [vmem:[%s1120_s5] sm:$0xf] }
 0x1d3   :  { %v568_v10 = vpop.f32.mrf.mxu1 }
 0x1d4   :  { %v621_v55 = vmax.f32 %v577_v51, 0.0  ;;  %v569_v61 = vadd.f32 %v568_v10, %v413_v50  ;;  %v617_v10 = vmax.f32 %v561_v63, 0.0 }
 0x1d5   :  { %v806_v12 = vpop.f32.mrf.mxu1 }
 0x1d6   :  { %v580_v47 = vadd.f32 %v806_v12, %v428_v37  ;;  %v619_v0 = vmax.f32 %v569_v61, 0.0  ;;  %v633_v6 = vpack.c.bf16 %v618_v2, %v617_v10 }
 0x1d7   :  { %v571_v13 = vpop.f32.mrf.mxu1 }
 0x1d8   :  { %v622_v58 = vmax.f32 %v580_v47, 0.0  ;;  %v572_v56 = vadd.f32 %v571_v13, %v418_v46  ;;  %v616_v13 = vmax.f32 %v556_v8, 0.0 }
 0x1d9   :  { %v809_v15 = vpop.f32.mrf.mxu1 }
 0x1da   :  { %v593_v38 = vadd.f32 %v809_v15, %v443_v21  ;;  %v635_v54 = vpack.c.bf16 %v622_v58, %v621_v55  ;;  %v620_v52 = vmax.f32 %v572_v56, 0.0 }
 0x1db   :  { %v584_v17 = vpop.f32.mrf.mxu1 }
 0x1dc   :  { %v625_v44 = vmax.f32 %v593_v38, 0.0  ;;  %v585_v45 = vadd.f32 %v584_v17, %v433_v28 }
 0x1dd   :  { %v810_v18 = vpop.f32.mrf.mxu1 }
 0x1de   :  { %v596_v34 = vadd.f32 %v810_v18, %v448_v19  ;;  %v623_v57 = vmax.f32 %v585_v45, 0.0 }
 0x1df   :  { %v587_v20 = vpop.f32.mrf.mxu1 }
 0x1e0   :  { %v626_v41 = vmax.f32 %v596_v34, 0.0  ;;  %v588_v42 = vadd.f32 %v587_v20, %v438_v25 }
 0x1e1   :  { %v813_v22 = vpop.f32.mrf.mxu1 }
 0x1e2   :  { %v609_v24 = vadd.f32 %v813_v22, %v463_v11  ;;  %v637_v48 = vpack.c.bf16 %v626_v41, %v625_v44  ;;  %v624_v49 = vmax.f32 %v588_v42, 0.0  ;;  %v393_v11 = vpop.permute.xlu0 %392 }
 0x1e3   :  { %v600_v23 = vpop.f32.mrf.mxu1  ;;  %v553_v12 = vadd.f32 %v1094_v5, %v393_v11 }
 0x1e4   :  { %v629_v30 = vmax.f32 %v609_v24, 0.0  ;;  %v601_v31 = vadd.f32 %v600_v23, %v453_v16  ;;  %v636_v59 = vpack.c.bf16 %v624_v49, %v623_v57 }
 0x1e5   :  { %v814_v26 = vpop.f32.mrf.mxu1 }
 0x1e6   :  { %v612_v27 = vadd.f32 %v814_v26, %v468_v9  ;;  %v627_v39 = vmax.f32 %v601_v31, 0.0  ;;  %v634_v9 = vpack.c.bf16 %v620_v52, %v619_v0  ;;  %v644_v15 = vpop.permute.xlu0 %643 }
 0x1e7   :  { %v603_v29 = vpop.f32.mrf.mxu1 }
 0x1e8   :  { %v630_v32 = vmax.f32 %v612_v27, 0.0  ;;  %v604_v33 = vadd.f32 %v603_v29, %v458_v14  ;;  %v615_v14 = vmax.f32 %v553_v12, 0.0 }
 0x1ea   :  { %v639_v35 = vpack.c.bf16 %v630_v32, %v629_v30  ;;  %v628_v36 = vmax.f32 %v604_v33, 0.0  ;;  %v632_v4 = vpack.c.bf16 %v616_v13, %v615_v14 }
 0x1ec   :  { %816 = vmatpush3.bf16.msra.mxu0 %v639_v35  ;;  %v638_v43 = vpack.c.bf16 %v628_v36, %v627_v39 }
 0x1ed   :  { %817 = vmatprep.subr.bf16.mxu0 %v849_v3 }
 0x1f0   :  { %818 = vmatpush3.bf16.msra.mxu0 %v638_v43 }
 0x1f1   :  { %819 = vmatprep.subr.bf16.mxu0 %v849_v3 }
 0x1f4   :  { %820 = vmatpush3.bf16.msra.mxu0 %v637_v48 }
 0x1f5   :  { %821 = vmatprep.subr.bf16.mxu0 %v849_v3 }
 0x1f8   :  { %822 = vmatpush3.bf16.msra.mxu0 %v636_v59 }
 0x1f9   :  { %823 = vmatprep.subr.bf16.mxu0 %v849_v3 }
 0x1fc   :  { %824 = vmatpush3.bf16.msra.mxu0 %v635_v54 }
 0x1fd   :  { %825 = vmatprep.subr.bf16.mxu0 %v849_v3 }
 0x200   :  { %826 = vmatpush3.bf16.msra.mxu0 %v634_v9 }
 0x201   :  { %827 = vmatprep.subr.bf16.mxu0 %v849_v3 }
 0x204   :  { %828 = vmatpush3.bf16.msra.mxu0 %v633_v6 }
 0x205   :  { %829 = vmatprep.subr.bf16.mxu0 %v849_v3 }
 0x208   :  { %830 = vmatpush3.bf16.msra.mxu0 %v632_v4 }
 0x20b   :  { %832 = vmatmul.mubr.bf16.vlgmr.msra.gmra.mxu0 %v631_v7 }
 0x2cb   :  { %v680_v16 = vpop.f32.mrf.mxu0 }
 0x2cc   :  { %v681_v17 = vadd.f32 %v680_v16, %v644_v15 }
 0x2cd   :  { %v833_v5 = vpop.f32.mrf.mxu0 }
 0x2ce   :  { %686 = vst [vmem:[%s1121_s7] sm:$0xff] %v681_v17 }
 0x2cf   :  { %v683_v18 = vpop.f32.mrf.mxu0 }
 0x2d1   :  { %v834_v19 = vpop.f32.mrf.mxu0 }

</bundles_post_ra>
